<compile_context>
chip_gen: v7x
topology: tpu7x:2x2x1
jax: 0.10.0
libtpu: 0.0.40
codegen_flags: <defaults>
</compile_context>

<pallas_src>
import math

import jax
import jax.numpy as jnp
from jax.experimental import pallas as pl
from jax.experimental.pallas import tpu as pltpu

N_INPUTS = 8
N_HIDDEN = 32
N_OUTPUTS = 4


def policy_kernel(x_ref, w1_ref, b1_ref, w2_ref, b2_ref, w3_ref, b3_ref, o_ref):
    """One batch tile: Linear->Tanh->Linear->Tanh->Linear->Softmax (classes on axis 0)."""
    bf16 = jnp.bfloat16
    x = x_ref[...]                                                        # (8, TB) f32
    # bf16 MXU operands, f32 accumulation; elementwise/transcendental math in f32.
    h1 = jnp.tanh(
        jnp.dot(w1_ref[...].astype(bf16), x.astype(bf16),
                preferred_element_type=jnp.float32) + b1_ref[...])        # (32, TB)
    h2 = jnp.tanh(
        jnp.dot(w2_ref[...].astype(bf16), h1.astype(bf16),
                preferred_element_type=jnp.float32) + b2_ref[...])        # (32, TB)
    logits = (
        jnp.dot(w3_ref[...].astype(bf16), h2.astype(bf16),
                preferred_element_type=jnp.float32) + b3_ref[...])        # (4, TB)
    # Numerically-stable softmax over the 4 classes (sublane axis), per batch column.
    m = jnp.max(logits, axis=0, keepdims=True)
    e = jnp.exp(logits - m)
    o_ref[...] = e / jnp.sum(e, axis=0, keepdims=True)


def lunar_lander_policy_forward(x, params, *, tb=512):
    """x: (B, N_INPUTS) f32  ->  (B, N_OUTPUTS) softmax probabilities.

    NOTE: a pallas_call has fixed multi-microsecond launch/DMA-setup cost; for tiny
    per-step batches (e.g. a single env observation) batch many rows per call or use
    plain XLA — the kernel pays off at B >= a few hundred rows.
    """
    w1, b1, w2, b2, w3, b3 = params
    B = x.shape[0]
    # Batch tile on the lane axis: multiple of 128, capped by the (128-rounded) batch.
    TB = min(tb, pl.cdiv(B, 128) * 128)
    grid = (pl.cdiv(B, TB),)

    # Weights/biases: full-array blocks, constant index_map -> fetched once, VMEM-resident.
    const = lambda shape: pl.BlockSpec(shape, lambda i: (0, 0))

    out_t = pl.pallas_call(
        policy_kernel,
        out_shape=jax.ShapeDtypeStruct((N_OUTPUTS, B), jnp.float32),
        grid=grid,
        in_specs=[
            pl.BlockSpec((N_INPUTS, TB), lambda i: (0, i)),   # x^T tiled over batch lanes
            const((N_HIDDEN, N_INPUTS)),                      # W1^T
            const((N_HIDDEN, 1)),                             # b1
            const((N_HIDDEN, N_HIDDEN)),                      # W2^T
            const((N_HIDDEN, 1)),                             # b2
            const((N_OUTPUTS, N_HIDDEN)),                     # W3^T
            const((N_OUTPUTS, 1)),                            # b3
        ],
        out_specs=pl.BlockSpec((N_OUTPUTS, TB), lambda i: (0, i)),
        compiler_params=pltpu.CompilerParams(
            dimension_semantics=("parallel",)),               # shard batch tiles across TCs (v7x)
    )(
        x.T,                                                  # (8, B)
        w1.T, b1.reshape(N_HIDDEN, 1),
        w2.T, b2.reshape(N_HIDDEN, 1),
        w3.T, b3.reshape(N_OUTPUTS, 1),
    )
    return out_t.T                                            # (B, 4)


def init_params(key):
    """Deterministic init mimicking torch.nn.Linear default (U[-1/sqrt(fan_in), 1/sqrt(fan_in)]).

    Weights stored as (in_features, out_features) so the reference computes x @ W + b.
    """
    keys = jax.random.split(key, 6)

    def linear(kw, kb, fan_in, fan_out):
        bound = 1.0 / math.sqrt(fan_in)
        w = jax.random.uniform(kw, (fan_in, fan_out), jnp.float32, -bound, bound)
        b = jax.random.uniform(kb, (fan_out,), jnp.float32, -bound, bound)
        return w, b

    w1, b1 = linear(keys[0], keys[1], N_INPUTS, N_HIDDEN)
    w2, b2 = linear(keys[2], keys[3], N_HIDDEN, N_HIDDEN)
    w3, b3 = linear(keys[4], keys[5], N_HIDDEN, N_OUTPUTS)
    return (w1, b1, w2, b2, w3, b3)


def reference_forward_f32(x, params):
    """Pure-f32 JAX reference matching the PyTorch module exactly."""
    w1, b1, w2, b2, w3, b3 = params
    h1 = jnp.tanh(x @ w1 + b1)
    h2 = jnp.tanh(h1 @ w2 + b2)
    logits = h2 @ w3 + b3
    return jax.nn.softmax(logits, axis=1)


if __name__ == "__main__":
    key = jax.random.PRNGKey(0)
    k_params, k_x1, k_x2 = jax.random.split(key, 3)
    params = init_params(k_params)

    # Small spec-consistent batch (matches the PyTorch module's (B, 8) observations).
    x_small = jax.random.normal(k_x1, (2, N_INPUTS), jnp.float32)
    out_small = jax.block_until_ready(lunar_lander_policy_forward(x_small, params))
    ref_small = reference_forward_f32(x_small, params)
    assert out_small.shape == (2, N_OUTPUTS)
    # Rows of the softmax must sum to 1 (softmax itself is exact f32 in-kernel).
    assert jnp.allclose(jnp.sum(out_small, axis=1), jnp.ones((2,)), atol=1e-5)
    # bf16 MXU operands -> compare to the f32 reference with a bf16-appropriate tolerance.
    assert jnp.allclose(out_small, ref_small, atol=3e-2, rtol=0.0), "mismatch vs f32 reference"

    # Larger batch exercising the multi-step grid and a partial final tile.
    x_big = jax.random.normal(k_x2, (387, N_INPUTS), jnp.float32)
    out_big = jax.block_until_ready(lunar_lander_policy_forward(x_big, params, tb=128))
    ref_big = reference_forward_f32(x_big, params)
    assert out_big.shape == (387, N_OUTPUTS)
    assert jnp.allclose(jnp.sum(out_big, axis=1), jnp.ones((387,)), atol=1e-5)
    assert jnp.allclose(out_big, ref_big, atol=3e-2, rtol=0.0), "mismatch vs f32 reference (tiled)"

    print("KERNEL_OK")
</pallas_src>

<mosaic_0001>
module attributes {stable_mosaic.version = 11 : i64} {
  func.func @policy_kernel(%arg0: i32, %arg1: memref<8x128xf32, #tpu.memory_space<vmem>>, %arg2: memref<32x8xf32, #tpu.memory_space<vmem>>, %arg3: memref<32x1xf32, #tpu.memory_space<vmem>>, %arg4: memref<32x32xf32, #tpu.memory_space<vmem>>, %arg5: memref<32x1xf32, #tpu.memory_space<vmem>>, %arg6: memref<4x32xf32, #tpu.memory_space<vmem>>, %arg7: memref<4x1xf32, #tpu.memory_space<vmem>>, %arg8: memref<4x128xf32, #tpu.memory_space<vmem>>) attributes {dimension_semantics = [#tpu.dimension_semantics<parallel>], iteration_bounds = array<i64: 1>, scalar_prefetch = 0 : i64, scratch_operands = 0 : i64, tpu.core_type = #tpu.core_type<tc>, window_params = [{transform_indices = @transform_0, window_bounds = array<i64: 8, 128>}, {pipeline_mode = #tpu.pipeline_mode<synchronous>, transform_indices = @transform_1, window_bounds = array<i64: 32, 8>}, {pipeline_mode = #tpu.pipeline_mode<synchronous>, transform_indices = @transform_2, window_bounds = array<i64: 32, 1>}, {pipeline_mode = #tpu.pipeline_mode<synchronous>, transform_indices = @transform_3, window_bounds = array<i64: 32, 32>}, {pipeline_mode = #tpu.pipeline_mode<synchronous>, transform_indices = @transform_4, window_bounds = array<i64: 32, 1>}, {pipeline_mode = #tpu.pipeline_mode<synchronous>, transform_indices = @transform_5, window_bounds = array<i64: 4, 32>}, {pipeline_mode = #tpu.pipeline_mode<synchronous>, transform_indices = @transform_6, window_bounds = array<i64: 4, 1>}, {transform_indices = @transform_7, window_bounds = array<i64: 4, 128>}]} {
    %c0 = arith.constant 0 : index
    %c0_0 = arith.constant 0 : index
    %0 = vector.load %arg1[%c0, %c0_0] : memref<8x128xf32, #tpu.memory_space<vmem>>, vector<8x128xf32>
    %c0_1 = arith.constant 0 : index
    %c0_2 = arith.constant 0 : index
    %1 = vector.load %arg2[%c0_1, %c0_2] : memref<32x8xf32, #tpu.memory_space<vmem>>, vector<32x8xf32>
    %2 = arith.truncf %1 : vector<32x8xf32> to vector<32x8xbf16>
    %3 = arith.truncf %0 : vector<8x128xf32> to vector<8x128xbf16>
    %cst = arith.constant dense<0.000000e+00> : vector<32x128xf32>
    %4 = tpu.matmul %2, %3, %cst {dimension_numbers = #tpu.dot_dimension_numbers<[1], [0], [0], [1], [0, 0, 1, 1], [], []>} : vector<32x8xbf16>, vector<8x128xbf16>, vector<32x128xf32> -> vector<32x128xf32>
    %c0_3 = arith.constant 0 : index
    %c0_4 = arith.constant 0 : index
    %5 = vector.load %arg3[%c0_3, %c0_4] : memref<32x1xf32, #tpu.memory_space<vmem>>, vector<32x1xf32>
    %6 = vector.broadcast %5 : vector<32x1xf32> to vector<32x128xf32>
    %7 = arith.addf %4, %6 : vector<32x128xf32>
    %8 = math.tanh %7 : vector<32x128xf32>
    %c0_5 = arith.constant 0 : index
    %c0_6 = arith.constant 0 : index
    %9 = vector.load %arg4[%c0_5, %c0_6] : memref<32x32xf32, #tpu.memory_space<vmem>>, vector<32x32xf32>
    %10 = arith.truncf %9 : vector<32x32xf32> to vector<32x32xbf16>
    %11 = arith.truncf %8 : vector<32x128xf32> to vector<32x128xbf16>
    %cst_7 = arith.constant dense<0.000000e+00> : vector<32x128xf32>
    %12 = tpu.matmul %10, %11, %cst_7 {dimension_numbers = #tpu.dot_dimension_numbers<[1], [0], [0], [1], [0, 0, 1, 1], [], []>} : vector<32x32xbf16>, vector<32x128xbf16>, vector<32x128xf32> -> vector<32x128xf32>
    %c0_8 = arith.constant 0 : index
    %c0_9 = arith.constant 0 : index
    %13 = vector.load %arg5[%c0_8, %c0_9] : memref<32x1xf32, #tpu.memory_space<vmem>>, vector<32x1xf32>
    %14 = vector.broadcast %13 : vector<32x1xf32> to vector<32x128xf32>
    %15 = arith.addf %12, %14 : vector<32x128xf32>
    %16 = math.tanh %15 : vector<32x128xf32>
    %c0_10 = arith.constant 0 : index
    %c0_11 = arith.constant 0 : index
    %17 = vector.load %arg6[%c0_10, %c0_11] : memref<4x32xf32, #tpu.memory_space<vmem>>, vector<4x32xf32>
    %18 = arith.truncf %17 : vector<4x32xf32> to vector<4x32xbf16>
    %19 = arith.truncf %16 : vector<32x128xf32> to vector<32x128xbf16>
    %cst_12 = arith.constant dense<0.000000e+00> : vector<4x128xf32>
    %20 = tpu.matmul %18, %19, %cst_12 {dimension_numbers = #tpu.dot_dimension_numbers<[1], [0], [0], [1], [0, 0, 1, 1], [], []>} : vector<4x32xbf16>, vector<32x128xbf16>, vector<4x128xf32> -> vector<4x128xf32>
    %c0_13 = arith.constant 0 : index
    %c0_14 = arith.constant 0 : index
    %21 = vector.load %arg7[%c0_13, %c0_14] : memref<4x1xf32, #tpu.memory_space<vmem>>, vector<4x1xf32>
    %22 = vector.broadcast %21 : vector<4x1xf32> to vector<4x128xf32>
    %23 = arith.addf %20, %22 : vector<4x128xf32>
    %cst_15 = arith.constant dense<0xFF800000> : vector<128xf32>
    %24 = vector.multi_reduction <maximumf>, %23, %cst_15 [0] : vector<4x128xf32> to vector<128xf32>
    %25 = vector.shape_cast %24 : vector<128xf32> to vector<1x128xf32>
    %26 = vector.broadcast %25 : vector<1x128xf32> to vector<4x128xf32>
    %27 = arith.subf %23, %26 : vector<4x128xf32>
    %28 = math.exp %27 : vector<4x128xf32>
    %cst_16 = arith.constant dense<0.000000e+00> : vector<128xf32>
    %29 = vector.multi_reduction <add>, %28, %cst_16 [0] : vector<4x128xf32> to vector<128xf32>
    %30 = vector.shape_cast %29 : vector<128xf32> to vector<1x128xf32>
    %31 = vector.broadcast %30 : vector<1x128xf32> to vector<4x128xf32>
    %32 = arith.divf %28, %31 : vector<4x128xf32>
    %c0_17 = arith.constant 0 : index
    %c0_18 = arith.constant 0 : index
    %33 = vector.load %arg8[%c0_17, %c0_18] : memref<4x128xf32, #tpu.memory_space<vmem>>, vector<4x128xf32>
    tpu.vector_store %arg8[%c0_17, %c0_18], %32 {strides = array<i32>} : memref<4x128xf32, #tpu.memory_space<vmem>>, vector<4x128xf32>,
    return
  }
  func.func @transform_0(%arg0: i32) -> (i32, i32) {
    %c0_i32 = arith.constant 0 : i32
    %c0_i32_0 = arith.constant 0 : i32
    return %c0_i32, %arg0 : i32, i32
  }
  func.func @transform_1(%arg0: i32) -> (i32, i32) {
    %c0_i32 = arith.constant 0 : i32
    %c0_i32_0 = arith.constant 0 : i32
    %c0_i32_1 = arith.constant 0 : i32
    return %c0_i32, %c0_i32_0 : i32, i32
  }
  func.func @transform_2(%arg0: i32) -> (i32, i32) {
    %c0_i32 = arith.constant 0 : i32
    %c0_i32_0 = arith.constant 0 : i32
    %c0_i32_1 = arith.constant 0 : i32
    return %c0_i32, %c0_i32_0 : i32, i32
  }
  func.func @transform_3(%arg0: i32) -> (i32, i32) {
    %c0_i32 = arith.constant 0 : i32
    %c0_i32_0 = arith.constant 0 : i32
    %c0_i32_1 = arith.constant 0 : i32
    return %c0_i32, %c0_i32_0 : i32, i32
  }
  func.func @transform_4(%arg0: i32) -> (i32, i32) {
    %c0_i32 = arith.constant 0 : i32
    %c0_i32_0 = arith.constant 0 : i32
    %c0_i32_1 = arith.constant 0 : i32
    return %c0_i32, %c0_i32_0 : i32, i32
  }
  func.func @transform_5(%arg0: i32) -> (i32, i32) {
    %c0_i32 = arith.constant 0 : i32
    %c0_i32_0 = arith.constant 0 : i32
    %c0_i32_1 = arith.constant 0 : i32
    return %c0_i32, %c0_i32_0 : i32, i32
  }
  func.func @transform_6(%arg0: i32) -> (i32, i32) {
    %c0_i32 = arith.constant 0 : i32
    %c0_i32_0 = arith.constant 0 : i32
    %c0_i32_1 = arith.constant 0 : i32
    return %c0_i32, %c0_i32_0 : i32, i32
  }
  func.func @transform_7(%arg0: i32) -> (i32, i32) {
    %c0_i32 = arith.constant 0 : i32
    %c0_i32_0 = arith.constant 0 : i32
    return %c0_i32, %arg0 : i32, i32
  }
}

</mosaic_0001>

<bundles_post_ra>
// kernel: tpu_custom_call.1
= control target key start
LH: loop header
LB: loop body
LE: loop exit
PB: predicated region body
PF: predicated region fallthrough
CT: control target
= control target key end

     0   :  { %vm66_vm0 = vcmask 1043456   ;;  %vm59_vm1 = vcmask 64512   ;;  %v355_v3 = vmov 0   ;;  %vm155_vm2 = vcmask 261120   ;;  %s467_s0 = inlined_call_operand.vmem [shape: f32[8,2], index: 0, kind: input, shape index: {}]   ;;  %s468_s1 = inlined_call_operand.vmem [shape: f32[32,8], index: 1, kind: input, shape index: {}]   ;;  %s469_s2 = inlined_call_operand.vmem [shape: f32[32,1], index: 2, kind: input, shape index: {}]   ;;  %s470_s4 = inlined_call_operand.vmem [shape: f32[32,1], index: 4, kind: input, shape index: {}]   ;;  %s471_s6 = inlined_call_operand.vmem [shape: f32[4,1], index: 6, kind: input, shape index: {}]   ;;  %s472_s3 = inlined_call_operand.vmem [shape: f32[32,32], index: 3, kind: input, shape index: {}]   ;;  %s473_s5 = inlined_call_operand.vmem [shape: f32[4,32], index: 5, kind: input, shape index: {}]   ;;  %s474_s7 = inlined_call_operand.vmem [shape: f32[4,2], index: 7, kind: output, shape index: {}]  }
   0x1   :  { %v27_v0 = vld [vmem:[%s467_s0] sm:$0xff]  ;;  %v29_v2 = vld [vmem:[%s468_s1 + $0x8] sm:$0xff]  ;;  %333 = vset.pattern.permute.xlu0 %v355_v3  ;;  %334 = vset.pattern.permute.xlu1 %v355_v3  ;;  %v30_v6 = vld [vmem:[%s468_s1 + $0x10] sm:$0xff]  ;;  %v356_v43 = vmov 0.0   ;;  %vm357_vm3 = vmmov 0  }
   0x2   :  { %v28_v1 = vld [vmem:[%s468_s1] sm:$0xff]  ;;  %v34_v4 = vpack.c.bf16 %v27_v0, %v27_v0  ;;  %v31_v7 = vld [vmem:[%s468_s1 + $0x18] sm:$0xff]  ;;  %v37_v9 = vld [vmem:[%s469_s2 + $0x10] sm:$0xff] }
   0x3   :  { %v32_v5 = vpack.c.bf16 %v29_v2, %v28_v1  ;;  %v35_v8 = vld [vmem:[%s469_s2] sm:$0xff]  ;;  %v33_v11 = vpack.c.bf16 %v31_v7, %v30_v6  ;;  %v36_v12 = vld [vmem:[%s469_s2 + $0x8] sm:$0xff]  ;;  %51 = vperm.xlu1 %334, %v37_v9   ;;  %v38_v13 = vld [vmem:[%s469_s2 + $0x18] sm:$0xff] }
   0x4   :  { %41 = vperm.xlu0 %333, %v35_v8   ;;  %329 = vmatprep.subr.msk.bf16.mxu0 %vm66_vm0, %v34_v4  ;;  %v68_v10 = vsel %vm66_vm0, %v34_v4, 0  ;;  %v131_v14 = vld [vmem:[%s470_s4] sm:$0xff]  ;;  %v132_v15 = vld [vmem:[%s470_s4 + $0x8] sm:$0xff]  ;;  %v133_v16 = vld [vmem:[%s470_s4 + $0x10] sm:$0xff] }
   0x5   :  { %309 = vmatprep.mubr.msk.bf16.mxu0 %vm59_vm1, %v32_v5  ;;  %308 = vmatpush3.bf16.msra.mxu0 %v68_v10  ;;  %v134_v17 = vld [vmem:[%s470_s4 + $0x18] sm:$0xff]  ;;  %v219_v18 = vld [vmem:[%s471_s6] sm:$0xf]  ;;  %v124_v20 = vld [vmem:[%s472_s3 + $0x8] sm:$0xff] }
   0x6   :  { %v123_v19 = vld [vmem:[%s472_s3] sm:$0xff]  ;;  %v125_v40 = vld [vmem:[%s472_s3 + $0x10] sm:$0xff]  ;;  %v126_v41 = vld [vmem:[%s472_s3 + $0x18] sm:$0xff]  ;;  %321 = vmatprep.subr.bf16.mxu0 %v356_v43 }
   0x7   :  { %56 = vperm.xlu1 %334, %v38_v13   ;;  %v127_v21 = vpack.c.bf16 %v124_v20, %v123_v19  ;;  %v128_v42 = vpack.c.bf16 %v126_v41, %v125_v40  ;;  %v215_v62 = vld [vmem:[%s473_s5] sm:$0xf] }
   0x8   :  { %46 = vperm.xlu0 %333, %v36_v12   ;;  %310 = vmatmul.mubr.msk.bf16.vlgmr.msra.gmra.mrb[0].mxu0 %vm59_vm1, %v33_v11  ;;  %v216_v63 = vpack.c.bf16 %v215_v62, %v215_v62 }
   0x9   :  { %317 = vmatprep.mubr.msk.bf16.mxu1 %vm155_vm2, %v127_v21  ;;  %325 = vmatprep.mubr.msk.bf16.mxu0 %vm357_vm3, %v356_v43 }
   0xb   :  { %142 = vperm.xlu1 %334, %v132_v15  }
   0xc   :  { %137 = vperm.xlu0 %333, %v131_v14  }
   0xf   :  { %152 = vperm.xlu1 %334, %v134_v17  }
  0x10   :  { %147 = vperm.xlu0 %333, %v133_v16  }
  0x14   :  { %222 = vperm.xlu0 %333, %v219_v18  }
  0x82   :  { %v52_v22 = vpop.permute.xlu1 %51 }
  0x83   :  { %v42_v23 = vpop.permute.xlu0 %41 }
  0x86   :  { %v57_v27 = vpop.permute.xlu1 %56 }
  0x87   :  { %v47_v30 = vpop.permute.xlu0 %46 }
  0x8a   :  { %v143_v45 = vpop.permute.xlu1 %142 }
  0x8b   :  { %v138_v44 = vpop.permute.xlu0 %137 }
  0x8e   :  { %v153_v50 = vpop.permute.xlu1 %152 }
  0x8f   :  { %v148_v46 = vpop.permute.xlu0 %147 }
  0x93   :  { %v223_v0 = vpop.permute.xlu0 %222 }
  0xdb   :  { %v311_v24 = vpop.f32.mrb[0].mxu0 }
  0xdc   :  { %v113_v25 = vadd.f32 %v311_v24, %v52_v22  ;;  %v104_v26 = vpop.f32.mrb[1].mxu0 }
  0xdd   :  { %v105_v28 = vadd.f32 %v104_v26, %v42_v23  ;;  %v312_v29 = vpop.f32.mrb[2].mxu0 }
  0xde   :  { %335 = vtanh.f32 %v113_v25  ;;  %v116_v31 = vadd.f32 %v312_v29, %v57_v27  ;;  %v107_v32 = vpop.f32.mrb[3].mxu0 }
  0xdf   :  { %337 = vtanh.f32 %v105_v28  ;;  %v108_v33 = vadd.f32 %v107_v32, %v47_v30 }
  0xe0   :  { %339 = vtanh.f32 %v116_v31 }
  0xe1   :  { %341 = vtanh.f32 %v108_v33 }
  0xe8   :  { %v336_v34 = vpop.eup %335 }
  0xe9   :  { %v338_v35 = vpop.eup %337 }
  0xea   :  { %v340_v36 = vpop.eup %339 }
  0xeb   :  { %v342_v37 = vpop.eup %341  ;;  %v130_v38 = vpack.c.bf16 %v340_v36, %v336_v34 }
  0xec   :  { %v129_v39 = vpack.c.bf16 %v342_v37, %v338_v35 }
  0xee   :  { %313 = vmatprep.subr.bf16.mxu1 %v129_v39 }
  0xef   :  { %314 = vmatpush3.bf16.msra.mxu1 %v129_v39 }
  0xf0   :  { %315 = vmatprep.subr.bf16.mxu1 %v130_v38 }
  0xf3   :  { %316 = vmatpush3.bf16.msra.mxu1 %v130_v38 }
  0xf6   :  { %318 = vmatmul.mubr.msk.bf16.vlgmr.msra.gmra.mrb[0].mxu1 %vm155_vm2, %v128_v42 }
 0x1c9   :  { %v319_v47 = vpop.f32.mrb[0].mxu1 }
 0x1ca   :  { %v205_v48 = vadd.f32 %v319_v47, %v148_v46  ;;  %v196_v49 = vpop.f32.mrb[1].mxu1 }
 0x1cb   :  { %v197_v51 = vadd.f32 %v196_v49, %v138_v44  ;;  %v320_v52 = vpop.f32.mrb[2].mxu1 }
 0x1cc   :  { %343 = vtanh.f32 %v205_v48  ;;  %v208_v53 = vadd.f32 %v320_v52, %v153_v50  ;;  %v199_v54 = vpop.f32.mrb[3].mxu1 }
 0x1cd   :  { %345 = vtanh.f32 %v197_v51  ;;  %v200_v55 = vadd.f32 %v199_v54, %v143_v45 }
 0x1ce   :  { %347 = vtanh.f32 %v208_v53 }
 0x1cf   :  { %349 = vtanh.f32 %v200_v55 }
 0x1d6   :  { %v344_v56 = vpop.eup %343 }
 0x1d7   :  { %v346_v57 = vpop.eup %345 }
 0x1d8   :  { %v348_v58 = vpop.eup %347 }
 0x1d9   :  { %v350_v59 = vpop.eup %349  ;;  %v218_v60 = vpack.c.bf16 %v348_v58, %v344_v56 }
 0x1da   :  { %v217_v61 = vpack.c.bf16 %v350_v59, %v346_v57 }
 0x1dc   :  { %322 = vmatpush3.bf16.msra.mxu0 %v217_v61 }
 0x1dd   :  { %323 = vmatprep.subr.bf16.mxu0 %v356_v43 }
 0x1e0   :  { %324 = vmatpush3.bf16.msra.mxu0 %v218_v60 }
 0x1e3   :  { %326 = vmatmul.mubr.msk.bf16.vlgmr.msra.gmra.mrb[4].mxu0 %vm155_vm2, %v216_v63 }
 0x2b6   :  { %v262_v1 = vpop.f32.mrb[4].mxu0 }
 0x2b7   :  { %v263_v2 = vadd.f32 %v262_v1, %v223_v0  ;;  %v327_v3 = vpop.f32.mrb[5].mxu0 }
 0x2b8   :  { %v265_v4 = vpop.f32.mrb[6].mxu0 }
 0x2b9   :  { %v268_v5 = vsel %vm66_vm0, %v263_v2, -inf  ;;  %v328_v6 = vpop.f32.mrb[7].mxu0 }
 0x2ba   :  { %v269_v7 = vrot.slane %v268_v5, 4 }
 0x2bc   :  { %v270_v8 = vmax.f32 %v268_v5, %v269_v7 }
 0x2be   :  { %v271_v9 = vrot.slane %v270_v8, 2 }
 0x2c0   :  { %v272_v10 = vmax.f32 %v270_v8, %v271_v9 }
 0x2c2   :  { %v273_v11 = vrot.slane %v272_v10, 1 }
 0x2c4   :  { %v274_v12 = vmax.f32 %v272_v10, %v273_v11 }
 0x2c6   :  { %v275_v13 = vsub.f32 %v263_v2, %v274_v12 }
 0x2c8   :  { %v276_v14 = vmul.f32 1.442695, %v275_v13 }
 0x2ca   :  { %351 = vpow2.f32 %v276_v14 }
 0x2d4   :  { %v352_v15 = vpop.eup %351 }
 0x2d5   :  { %v278_v16 = vsel %vm66_vm0, %v352_v15, 0.0 }
 0x2d6   :  { %v279_v17 = vrot.slane %v278_v16, 4 }
 0x2d8   :  { %v280_v18 = vadd.f32 %v279_v17, %v278_v16 }
 0x2da   :  { %v281_v19 = vrot.slane %v280_v18, 2 }
 0x2dc   :  { %v282_v20 = vadd.f32 %v281_v19, %v280_v18 }
 0x2de   :  { %v283_v21 = vrot.slane %v282_v20, 1 }
 0x2e0   :  { %v284_v22 = vadd.f32 %v283_v21, %v282_v20 }
 0x2e2   :  { %353 = vrcp.f32 %v284_v22 }
 0x2ec   :  { %v354_v23 = vpop.eup %353 }
 0x2ed   :  { %v286_v24 = vmul.f32 %v354_v23, %v352_v15 }
 0x2ef   :  { %287 = vst [vmem:[%s474_s7] sm:$0xf] %v286_v24 }

</bundles_post_ra>
